<compile_context>
chip_gen: v7x
topology: tpu7x:2x2x1
jax: 0.10.0
libtpu: 0.0.40
codegen_flags: <defaults>
</compile_context>

<pallas_src>
import functools

import jax
import jax.numpy as jnp
from jax.experimental import pallas as pl
from jax.experimental.pallas import tpu as pltpu


def _focal_loss_kernel(x_ref, t_ref, o_ref, *, alpha, gamma, n_rows, tile_n):
    i = pl.program_id(0)

    x = x_ref[...].astype(jnp.float32)            # (TILE_N, C) logits, f32 math
    t = t_ref[...]                                # (TILE_N, 1) int32 labels

    # Stable log-softmax pieces over the class (lane) axis.
    m = jnp.max(x, axis=1, keepdims=True)         # (TILE_N, 1)
    z = x - m                                     # (TILE_N, C)
    lse = jnp.log(jnp.sum(jnp.exp(z), axis=1, keepdims=True))  # (TILE_N, 1)

    # Target-class gather fused into the shifted logits (one-hot select on z;
    # no log_probs materialization, no float one-hot multiply).
    col = jax.lax.broadcasted_iota(jnp.int32, x.shape, 1)       # (TILE_N, C)
    z_t = jnp.sum(jnp.where(col == t, z, 0.0), axis=1, keepdims=True)
    logpt = z_t - lse                              # (TILE_N, 1), <= 0
    pt = jnp.exp(logpt)

    one_minus_pt = jnp.maximum(1.0 - pt, 0.0)      # clamp fp round-off above 1
    if float(gamma) == int(gamma):
        focal = jax.lax.integer_pow(one_minus_pt, int(gamma))   # VPU only
    else:
        focal = one_minus_pt ** gamma              # general (EUP) path
    loss = (-alpha) * focal * logpt                # (TILE_N, 1)

    # Mask rows past the true batch size (remainder tile / padded rows) so the
    # wrapper-side mean divides by the true N.
    row = i * tile_n + jax.lax.broadcasted_iota(jnp.int32, loss.shape, 0)
    loss = jnp.where(row < n_rows, loss, 0.0)

    # Lane-dense partial-sum write (unmasked vst): broadcast the tile sum to
    # all 128 lanes; the wrapper reads lane 0 of each tile row.
    partial = jnp.sum(loss)
    o_ref[...] = jnp.full(o_ref.shape, partial, dtype=jnp.float32)


def focal_loss(logits, target, *, alpha=1.0, gamma=2.0, tile_n=None):
    """logits: (N, C) float; target: (N,) int. Returns scalar mean focal loss.

    Matches PyTorch FocalLoss(alpha, gamma, reduction='mean').forward.
    Inputs may be bf16 to halve HBM traffic; math is f32 in-kernel.
    """
    n, c = logits.shape
    t2d = target.astype(jnp.int32).reshape(n, 1)

    # Tile sizing: keep the logits tile ~<= 4 MiB so double-buffered inputs fit
    # comfortably inside the scoped-VMEM defaults on v5e/v6e/v7x, and cap at
    # 512 rows (near-roofline per the tiling measurements; taller tiles only
    # inflate lane-padded (TILE_N, 1) temporaries).
    if tile_n is None:
        itemsize = jnp.dtype(logits.dtype).itemsize
        rows_for_4mb = max(8, (4 << 20) // max(c * itemsize, 1))
        tile_n = min(512, rows_for_4mb)
    tile_n = max(8, (int(tile_n) // 8) * 8)        # sublane multiple of 8
    if tile_n >= n:
        tile_n = n                                 # single full-rows block

    num_tiles = pl.cdiv(n, tile_n)

    kernel = functools.partial(
        _focal_loss_kernel,
        alpha=float(alpha), gamma=float(gamma), n_rows=n, tile_n=tile_n)

    itemsize = jnp.dtype(logits.dtype).itemsize
    cost = pl.CostEstimate(
        flops=6 * n * c,                                   # sub/cmp/select/add per elem
        transcendentals=n * c + 2 * n,                     # exp(z), log(lse), exp(logpt)
        bytes_accessed=n * c * itemsize + n * 4 + num_tiles * 128 * 4,
    )

    partials = pl.pallas_call(
        kernel,
        out_shape=jax.ShapeDtypeStruct((num_tiles, 128), jnp.float32),
        grid=(num_tiles,),
        in_specs=[
            pl.BlockSpec((tile_n, c), lambda i: (i, 0)),   # logits tile
            pl.BlockSpec((tile_n, 1), lambda i: (i, 0)),   # labels tile
        ],
        out_specs=pl.BlockSpec((1, 128), lambda i: (i, 0)),  # per-tile partial
        compiler_params=pltpu.CompilerParams(
            dimension_semantics=("parallel",),     # shard tiles across TCs (v7x)
            vmem_limit_bytes=32 * 1024 * 1024,
        ),
        cost_estimate=cost,
    )(logits, t2d)

    # Final reduction (reduction='mean'): sum of per-tile partials / true N.
    return jnp.sum(partials[:, 0]) / jnp.float32(n)


if __name__ == "__main__":
    key = jax.random.PRNGKey(0)
    k1, k2 = jax.random.split(key)

    N, C = 8, 16  # small: 8 samples, 16 classes
    logits = jax.random.normal(k1, (N, C), dtype=jnp.float32)
    target = jax.random.randint(k2, (N,), 0, C, dtype=jnp.int32)

    loss = focal_loss(logits, target, alpha=1.0, gamma=2.0)
    jax.block_until_ready(loss)

    # Pure-JAX reference check (same math as the PyTorch module).
    lp = jax.nn.log_softmax(logits, axis=1)
    logpt = jnp.take_along_axis(lp, target[:, None], axis=1)[:, 0]
    pt = jnp.exp(logpt)
    ref = jnp.mean(-1.0 * (1.0 - pt) ** 2.0 * logpt)

    assert jnp.allclose(loss, ref, rtol=1e-5, atol=1e-5), (loss, ref)
    print("KERNEL_OK")
</pallas_src>

<mosaic_0001>
module attributes {stable_mosaic.version = 11 : i64} {
  func.func @_focal_loss_kernel(%arg0: i32, %arg1: memref<8x16xf32, #tpu.memory_space<vmem>>, %arg2: memref<8x1xi32, #tpu.memory_space<vmem>>, %arg3: memref<1x128xf32, #tpu.memory_space<vmem>>) attributes {dimension_semantics = [#tpu.dimension_semantics<parallel>], iteration_bounds = array<i64: 1>, scalar_prefetch = 0 : i64, scratch_operands = 0 : i64, tpu.core_type = #tpu.core_type<tc>, window_params = [{transform_indices = @transform_0, window_bounds = array<i64: 8, 16>}, {transform_indices = @transform_1, window_bounds = array<i64: 8, 1>}, {transform_indices = @transform_2, window_bounds = array<i64: 1, 128>}]} {
    %c0 = arith.constant 0 : index
    %c0_0 = arith.constant 0 : index
    %0 = vector.load %arg1[%c0, %c0_0] : memref<8x16xf32, #tpu.memory_space<vmem>>, vector<8x16xf32>
    %c0_1 = arith.constant 0 : index
    %c0_2 = arith.constant 0 : index
    %1 = vector.load %arg2[%c0_1, %c0_2] : memref<8x1xi32, #tpu.memory_space<vmem>>, vector<8x1xi32>
    %cst = arith.constant dense<0xFF800000> : vector<8xf32>
    %2 = vector.multi_reduction <maximumf>, %0, %cst [1] : vector<8x16xf32> to vector<8xf32>
    %3 = vector.shape_cast %2 : vector<8xf32> to vector<8x1xf32>
    %4 = vector.broadcast %3 : vector<8x1xf32> to vector<8x16xf32>
    %5 = arith.subf %0, %4 : vector<8x16xf32>
    %6 = math.exp %5 : vector<8x16xf32>
    %cst_3 = arith.constant dense<0.000000e+00> : vector<8xf32>
    %7 = vector.multi_reduction <add>, %6, %cst_3 [1] : vector<8x16xf32> to vector<8xf32>
    %8 = vector.shape_cast %7 : vector<8xf32> to vector<8x1xf32>
    %9 = math.log %8 : vector<8x1xf32>
    %10 = tpu.iota {dimensions = array<i32: 1>} : vector<8x16xi32>
    %11 = vector.broadcast %1 : vector<8x1xi32> to vector<8x16xi32>
    %12 = arith.cmpi eq, %10, %11 : vector<8x16xi32>
    %cst_4 = arith.constant 0.000000e+00 : f32
    %13 = vector.broadcast %cst_4 : f32 to vector<8x16xf32>
    %14 = arith.select %12, %5, %13 : vector<8x16xi1>, vector<8x16xf32>
    %cst_5 = arith.constant dense<0.000000e+00> : vector<8xf32>
    %15 = vector.multi_reduction <add>, %14, %cst_5 [1] : vector<8x16xf32> to vector<8xf32>
    %16 = vector.shape_cast %15 : vector<8xf32> to vector<8x1xf32>
    %17 = arith.subf %16, %9 : vector<8x1xf32>
    %18 = math.exp %17 : vector<8x1xf32>
    %cst_6 = arith.constant 1.000000e+00 : f32
    %19 = vector.broadcast %cst_6 : f32 to vector<8x1xf32>
    %20 = arith.subf %19, %18 : vector<8x1xf32>
    %cst_7 = arith.constant 0.000000e+00 : f32
    %21 = vector.broadcast %cst_7 : f32 to vector<8x1xf32>
    %22 = arith.maximumf %20, %21 : vector<8x1xf32>
    %23 = arith.mulf %22, %22 : vector<8x1xf32>
    %cst_8 = arith.constant -1.000000e+00 : f32
    %24 = vector.broadcast %cst_8 : f32 to vector<8x1xf32>
    %25 = arith.mulf %24, %23 : vector<8x1xf32>
    %26 = arith.mulf %25, %17 : vector<8x1xf32>
    %c8_i32 = arith.constant 8 : i32
    %27 = arith.muli %arg0, %c8_i32 : i32
    %28 = tpu.iota {dimensions = array<i32: 0>} : vector<8x1xi32>
    %29 = vector.broadcast %27 : i32 to vector<8x1xi32>
    %30 = arith.addi %29, %28 : vector<8x1xi32>
    %c8_i32_9 = arith.constant 8 : i32
    %31 = vector.broadcast %c8_i32_9 : i32 to vector<8x1xi32>
    %32 = arith.cmpi slt, %30, %31 : vector<8x1xi32>
    %cst_10 = arith.constant 0.000000e+00 : f32
    %33 = vector.broadcast %cst_10 : f32 to vector<8x1xf32>
    %34 = arith.select %32, %26, %33 : vector<8x1xi1>, vector<8x1xf32>
    %35 = vector.shape_cast %34 : vector<8x1xf32> to vector<1x8x1xf32>
    %cst_11 = arith.constant dense<0.000000e+00> : vector<1xf32>
    %36 = vector.multi_reduction <add>, %35, %cst_11 [1, 2] : vector<1x8x1xf32> to vector<1xf32>
    %37 = vector.shape_cast %36 : vector<1xf32> to vector<1x1x1xf32>
    %38 = vector.extract %37[0, 0, 0] : f32 from vector<1x1x1xf32>
    %39 = vector.broadcast %38 : f32 to vector<1x128xf32>
    %c0_12 = arith.constant 0 : index
    %c0_13 = arith.constant 0 : index
    %40 = vector.load %arg3[%c0_12, %c0_13] : memref<1x128xf32, #tpu.memory_space<vmem>>, vector<1x128xf32>
    tpu.vector_store %arg3[%c0_12, %c0_13], %39 {strides = array<i32>} : memref<1x128xf32, #tpu.memory_space<vmem>>, vector<1x128xf32>,
    return
  }
  func.func @transform_0(%arg0: i32) -> (i32, i32) {
    %c0_i32 = arith.constant 0 : i32
    %c0_i32_0 = arith.constant 0 : i32
    return %arg0, %c0_i32 : i32, i32
  }
  func.func @transform_1(%arg0: i32) -> (i32, i32) {
    %c0_i32 = arith.constant 0 : i32
    %c0_i32_0 = arith.constant 0 : i32
    return %arg0, %c0_i32 : i32, i32
  }
  func.func @transform_2(%arg0: i32) -> (i32, i32) {
    %c0_i32 = arith.constant 0 : i32
    %c0_i32_0 = arith.constant 0 : i32
    return %arg0, %c0_i32 : i32, i32
  }
}

</mosaic_0001>

<bundles_post_ra>
// kernel: tpu_custom_call.1
= control target key start
LH: loop header
LB: loop body
LE: loop exit
PB: predicated region body
PF: predicated region fallthrough
CT: control target
= control target key end

     0   :  { %vm14_vm0 = vcmask 130048   ;;  %s151_s0 = inlined_call_operand.vmem [shape: f32[8,16], index: 0, kind: input, shape index: {}]   ;;  %s152_s1 = inlined_call_operand.vmem [shape: s32[8,1], index: 1, kind: input, shape index: {}]   ;;  %s153_s2 = inlined_call_operand.hbm [shape: f32[1,128], index: 2, kind: output, shape index: {}]  }
   0x1   :  { %v12_v0 = vld [vmem:[%s151_s0] sm:$0xff] }
   0x2   :  { %7 = vsyncpa [#allocation3], 0  ;;  %v15_v1 = vsel %vm14_vm0, %v12_v0, -inf  ;;  %v113_v2 = vmov 0   ;;  %v13_v3 = vld [vmem:[%s152_s1] sm:$0xff]  ;;  %v26_v7 = vlaneseq  ;;  %vm51_vm2 = vcmask 7168  }
   0x3   :  { %82 = vset.pattern.permute.xlu0 %v113_v2  ;;  %s114_s0 = smov [#allocation2]  }
   0x4   :  { %16 = vmax.xlane.f32.xlu0 %v15_v1  ;;  %v27_v8 = vand.u32 127, %v26_v7  ;;  %s70_s1 = sshll.u32 %s114_s0, 4  ;;  %s71_s1 = int_to_ptr.vmem [resolvable:$true] %s70_s1 }
   0x5   :  { %s89_s14 = scalar_lea.vmem %s71_s1, 16  ;;  %s93_s15 = scalar_lea.vmem %s71_s1, 32 }
   0x6   :  { %p90_p0 = scmp.ne.s32.totalorder %s71_s1, %s89_s14  ;;  %p94_p1 = scmp.lt.s32.totalorder %s71_s1, %s71_s1 }
   0x7   :  { %p95_p2 = scmp.lt.s32.totalorder %s93_s15, %s89_s14 }
   0x9   :  { %p96_p3 = por %p95_p2, %p94_p1 }
   0xb   :  { %p97_p4 = pnand %p96_p3, %p90_p0 }
  0x1a   :  { %29 = vperm.xlu0 %82, %v13_v3  }
  0x91   :  { %v17_v4 = vpop.xlane.xlu0 %16 }
  0x92   :  { %v18_v5 = vsub.f32 %v12_v0, %v17_v4 }
  0x94   :  { %v19_v6 = vmul.f32 1.442695, %v18_v5 }
  0x96   :  { %83 = vpow2.f32 %v19_v6 }
  0x99   :  { %v30_v9 = vpop.permute.xlu0 %29 }
  0x9a   :  { %vm31_vm1 = vcmp.eq.s32.totalorder %v27_v8, %v30_v9 }
  0x9b   :  { %v32_v12 = vsel %vm31_vm1, %v18_v5, 0.0 }
  0x9c   :  { %v33_v13 = vsel %vm14_vm0, %v32_v12, 0.0 }
  0xa0   :  { %v84_v10 = vpop.eup %83 }
  0xa1   :  { %v21_v11 = vsel %vm14_vm0, %v84_v10, 0.0 }
  0xa2   :  { %22 = vadd.xlane.f32.xlu1 %v21_v11 }
  0xa6   :  { %34 = vadd.xlane.f32.xlu1 %v33_v13 }
 0x12f   :  { %v23_v14 = vpop.xlane.xlu1 %22 }
 0x130   :  { %85 = vlog2.f32 %v23_v14 }
 0x133   :  { %v35_v17 = vpop.xlane.xlu1 %34 }
 0x13a   :  { %v86_v15 = vpop.eup %85 }
 0x13b   :  { %v25_v16 = vmul.f32 0.6931472, %v86_v15 }
 0x13d   :  { %v36_v18 = vsub.f32 %v35_v17, %v25_v16 }
 0x13f   :  { %v37_v19 = vmul.f32 1.442695, %v36_v18 }
 0x141   :  { %87 = vpow2.f32 %v37_v19 }
 0x14b   :  { %v88_v20 = vpop.eup %87 }
 0x14c   :  { %v39_v21 = vsub.f32 1.0, %v88_v20 }
 0x14e   :  { %v40_v22 = vmax.f32 %v39_v21, 0.0 }
 0x150   :  { %v41_v23 = vmul.f32 %v40_v22, %v40_v22 }
 0x152   :  { %v42_v24 = vmul.f32 -1.0, %v41_v23 }
 0x154   :  { %v43_v25 = vmul.f32 %v42_v24, %v36_v18 }
 0x156   :  { %v52_v26 = vsel %vm51_vm2, %v43_v25, 0.0 }
 0x157   :  { %53 = vadd.xlane.f32.xlu1 %v52_v26 }
 0x1e4   :  { %v54_v27 = vpop.xlane.xlu1 %53 }
 0x1e5   :  { %v55_v28 = vrot.slane %v54_v27, 4 }
 0x1e7   :  { %v56_v29 = vadd.f32 %v55_v28, %v54_v27 }
 0x1e9   :  { %v57_v30 = vrot.slane %v56_v29, 2 }
 0x1eb   :  { %v58_v31 = vadd.f32 %v57_v30, %v56_v29 }
 0x1ed   :  { %v59_v32 = vrot.slane %v58_v31, 1 }
 0x1ef   :  { %v60_v33 = vadd.f32 %v59_v32, %v58_v31 }
 0x1f1   :  { %78 = vpush %v60_v33 }
 0x222   :  { %s79_s13 = spop %78 }
 0x223   :  { %v62_v34 = vstv %s79_s13 }
 0x224   :  { %63 = vst [vmem:[#allocation2] sm:$0x1] %v62_v34 }
 0x225   :  { %100 = shalt.err (!%p97_p4)
}
 0x226   :  { %s101_s18 = scalar_lea.hbm %s153_s2, 16 }
 0x227   :  { %p102_p5 = scmp.ne.s32.totalorder %s153_s2, %s101_s18  ;;  %p105_p6 = scmp.lt.u32.totalorder %s101_s18, %s153_s2 }
 0x229   :  { %p107_p7 = pnand %p105_p6, %p102_p5 }
 0x22b   :  { %110 = shalt.err (!%p107_p7)
}
 0x22c   :  { %73 = dma.vmem_to_hbm [thread:$0]  %s71_s1, 16, %s153_s2, [#allocation3]  }
 0x22d   :  { %111 = dma.done.wait [#allocation3], 16  }
 0x22e   :  { %112 = vsyncadd [#allocation3], 4294967280 }
 0x22f   :  { %77 = vsyncpa [#allocation3], 1 }

</bundles_post_ra>
